<compile_context>
chip_gen: v5e
topology: v5e:2x2
jax: 0.10.0
libtpu: 0.0.40
codegen_flags: <defaults>
</compile_context>

<pallas_src>
from functools import partial

import numpy as np
import jax
import jax.numpy as jnp
from jax.experimental import pallas as pl
from jax.experimental.pallas import tpu as pltpu


def _curl_kernel(p_ref, w_ref, b_ref, o_ref, *, n_slots, cout, neg_slope):
    """One (batch, P-tile) block.

    p_ref: (1, Kp, TILE_P)      bf16 superpatches (K = frame*frame*Cin window per pooled pixel)
    w_ref: (n_slots*Cout, Kp)   bf16 slot-embedded conv weight (resident)
    b_ref: (Cout, 1)            f32 bias (resident)
    o_ref: (1, Cout, TILE_P)    pooled + activated output (lane-dense stores)
    """
    # Single MXU call: (n_slots*Cout, Kp) @ (Kp, TILE_P) -> (n_slots*Cout, TILE_P), f32 acc.
    y4 = jnp.dot(w_ref[...], p_ref[0], preferred_element_type=jnp.float32)
    # 2x2 max-pool == max over the n_slots sublane groups.
    # Exact to do before bias+activation: bias is shared, LeakyReLU is monotone.
    y = y4[0:cout, :]
    for s in range(1, n_slots):
        y = jnp.maximum(y, y4[s * cout:(s + 1) * cout, :])
    y = y + b_ref[...]
    y = jnp.where(y > 0, y, neg_slope * y)
    o_ref[0] = y.astype(o_ref.dtype)


def _round_up(x, m):
    return (x + m - 1) // m * m


def _vmem_limit_bytes():
    try:
        cap = int(pltpu.get_tpu_info().vmem_capacity_bytes)
    except Exception:
        cap = 64 * 1024 * 1024          # conservative default (v7x per-TC VMEM)
    return min(cap * 3 // 4, 96 * 1024 * 1024)


def _pick_tile_p(p_total, kp, cout, n_slots, n_batch, vmem_limit):
    """Largest 128-multiple tile that fits the VMEM budget; >= 4 grid steps when possible."""
    lane = 128
    p_full = _round_up(p_total, lane)
    # bytes per lane-column: double-buffered in/out blocks + f32 kernel temporaries.
    per_col = 2 * (kp * 2) + 2 * (cout * 4) + (n_slots + 1) * cout * 4
    cap_budget = max(lane, (vmem_limit // 2) // per_col // lane * lane)
    cap_dma = max(lane, (8 * 1024 * 1024) // (kp * 2) // lane * lane)  # ~8 MiB input block
    tile_p = min(p_full, cap_budget, cap_dma)
    # v7x megacore: keep >= 4 parallel grid steps when the problem size allows it.
    while tile_p > lane and n_batch * (-(-p_total // tile_p)) < 4:
        tile_p = max(lane, (tile_p // 2) // lane * lane)
    return tile_p


def curl_conv_block(x, weight, bias, *, stride=2, padding=1, is_down=True, neg_slope=0.01):
    """x: (N, Cin, H, W) NCHW; weight: (Cout, Cin, KH, KW); bias: (Cout,). Returns NCHW."""
    N, Cin, H, W = x.shape
    Cout, _, KH, KW = weight.shape
    Ho = (H + 2 * padding - KH) // stride + 1
    Wo = (W + 2 * padding - KW) // stride + 1

    pool = 2 if is_down else 1
    Hp, Wp = Ho // pool, Wo // pool            # MaxPool2d(2,2) floor mode
    n_slots = pool * pool
    step = pool * stride                       # input stride between adjacent pooled pixels
    fh = (pool - 1) * stride + KH              # superpatch frame (5 when pooled, 3 otherwise)
    fw = (pool - 1) * stride + KW
    P = Hp * Wp
    K = fh * fw * Cin
    Kp = _round_up(K, 16)                      # bf16 sublane tile

    vmem_limit = _vmem_limit_bytes()
    tile_p = _pick_tile_p(P, Kp, Cout, n_slots, N, vmem_limit)
    n_ptiles = -(-P // tile_p)
    P_pad = n_ptiles * tile_p

    # ---- glue: superpatches in (N, K, P) layout (K on sublanes, P on lanes), bf16 ----
    # Stays NCHW the whole way: no NHWC transpose and no per-pool-slot duplication.
    x_pad = jnp.pad(x.astype(jnp.bfloat16),
                    ((0, 0), (0, 0), (padding, padding), (padding, padding)))
    cols = []
    for dh in range(fh):
        for dw in range(fw):
            sl = x_pad[:, :, dh:dh + (Hp - 1) * step + 1:step,
                             dw:dw + (Wp - 1) * step + 1:step]      # (N, Cin, Hp, Wp)
            cols.append(sl.reshape(N, Cin, P))
    patches = jnp.concatenate(cols, axis=1)                          # (N, K, P), K = (dh, dw, cin)
    patches = jnp.pad(patches, ((0, 0), (0, Kp - K), (0, P_pad - P)))

    # ---- slot-embedded weight: (n_slots*Cout, Kp) -- pool-slot selection folded into zeros ----
    wt = jnp.transpose(weight, (2, 3, 1, 0))                         # (KH, KW, Cin, Cout)
    w_full = jnp.zeros((n_slots, fh, fw, Cin, Cout), jnp.float32)
    for a in range(pool):
        for b in range(pool):
            s = a * pool + b
            w_full = w_full.at[s, a * stride:a * stride + KH,
                                  b * stride:b * stride + KW, :, :].set(wt)
    w_lhs = jnp.transpose(w_full.reshape(n_slots, K, Cout), (0, 2, 1)).reshape(n_slots * Cout, K)
    w_lhs = jnp.pad(w_lhs, ((0, 0), (0, Kp - K))).astype(jnp.bfloat16)
    b_mat = bias.reshape(Cout, 1).astype(jnp.float32)

    out = pl.pallas_call(
        partial(_curl_kernel, n_slots=n_slots, cout=Cout, neg_slope=neg_slope),
        out_shape=jax.ShapeDtypeStruct((N, Cout, P_pad), x.dtype),
        grid_spec=pltpu.PrefetchScalarGridSpec(
            num_scalar_prefetch=0,
            grid=(N, n_ptiles),
            in_specs=[
                pl.BlockSpec((1, Kp, tile_p), lambda n, p: (n, 0, p)),
                pl.BlockSpec((n_slots * Cout, Kp), lambda n, p: (0, 0)),  # resident
                pl.BlockSpec((Cout, 1), lambda n, p: (0, 0)),             # resident
            ],
            out_specs=pl.BlockSpec((1, Cout, tile_p), lambda n, p: (n, 0, p)),
        ),
        compiler_params=pltpu.CompilerParams(
            dimension_semantics=("parallel", "parallel"),
            vmem_limit_bytes=vmem_limit,
        ),
    )(patches, w_lhs, b_mat)

    # (N, Cout, P_pad) -> NCHW; drop the P padding, reshape is free (no transpose needed).
    return out[:, :, :P].reshape(N, Cout, Hp, Wp)


def _reference(x, weight, bias, *, is_down=True, neg_slope=0.01):
    Cout = weight.shape[0]
    y = jax.lax.conv_general_dilated(
        x, weight, window_strides=(2, 2), padding=((1, 1), (1, 1)),
        dimension_numbers=("NCHW", "OIHW", "NCHW")) + bias.reshape(1, Cout, 1, 1)
    y = jnp.where(y > 0, y, neg_slope * y)
    if is_down:
        y = jax.lax.reduce_window(y, -jnp.inf, jax.lax.max,
                                  (1, 1, 2, 2), (1, 1, 2, 2), "VALID")
    return y


if __name__ == "__main__":
    N, Cin, Cout, H, W = 2, 4, 8, 16, 16
    key = jax.random.PRNGKey(0)
    kw_, kb_, kx_ = jax.random.split(key, 3)

    # deterministic Conv2d-style init (uniform in +/- 1/sqrt(fan_in))
    fan_in = Cin * 3 * 3
    bound = 1.0 / np.sqrt(fan_in)
    weight = jax.random.uniform(kw_, (Cout, Cin, 3, 3), jnp.float32, -bound, bound)
    bias = jax.random.uniform(kb_, (Cout,), jnp.float32, -bound, bound)
    x = jax.random.normal(kx_, (N, Cin, H, W), jnp.float32)

    out = jax.block_until_ready(curl_conv_block(x, weight, bias, is_down=True))

    # Reference on bf16-rounded inputs (the kernel feeds the MXU bf16, accumulates in f32).
    x_bf = x.astype(jnp.bfloat16).astype(jnp.float32)
    w_bf = weight.astype(jnp.bfloat16).astype(jnp.float32)
    ref = jax.block_until_ready(_reference(x_bf, w_bf, bias, is_down=True))

    assert out.shape == (N, Cout, H // 4, W // 4), out.shape
    max_err = float(jnp.max(jnp.abs(out - ref)))
    assert jnp.allclose(out, ref, atol=1e-4, rtol=1e-4), max_err

    print("KERNEL_OK")
</pallas_src>

<mosaic_0001>
module attributes {stable_mosaic.version = 11 : i64} {
  func.func @_curl_kernel(%arg0: i32, %arg1: i32, %arg2: memref<1x112x128xbf16, #tpu.memory_space<vmem>>, %arg3: memref<32x112xbf16, #tpu.memory_space<vmem>>, %arg4: memref<8x1xf32, #tpu.memory_space<vmem>>, %arg5: memref<1x8x128xf32, #tpu.memory_space<vmem>>) attributes {dimension_semantics = [#tpu.dimension_semantics<parallel>, #tpu.dimension_semantics<parallel>], iteration_bounds = array<i64: 2, 1>, scalar_prefetch = 0 : i64, scratch_operands = 0 : i64, tpu.core_type = #tpu.core_type<tc>, window_params = [{transform_indices = @transform_0, window_bounds = array<i64: 1, 112, 128>}, {pipeline_mode = #tpu.pipeline_mode<synchronous>, transform_indices = @transform_1, window_bounds = array<i64: 32, 112>}, {pipeline_mode = #tpu.pipeline_mode<synchronous>, transform_indices = @transform_2, window_bounds = array<i64: 8, 1>}, {transform_indices = @transform_3, window_bounds = array<i64: 1, 8, 128>}]} {
    %c0 = arith.constant 0 : index
    %c0_0 = arith.constant 0 : index
    %0 = vector.load %arg3[%c0, %c0_0] : memref<32x112xbf16, #tpu.memory_space<vmem>>, vector<32x112xbf16>
    %c0_1 = arith.constant 0 : index
    %c0_2 = arith.constant 0 : index
    %c0_3 = arith.constant 0 : index
    %1 = vector.load %arg2[%c0_1, %c0_2, %c0_3] : memref<1x112x128xbf16, #tpu.memory_space<vmem>>, vector<1x112x128xbf16>
    %2 = vector.shape_cast %1 : vector<1x112x128xbf16> to vector<112x128xbf16>
    %cst = arith.constant dense<0.000000e+00> : vector<32x128xf32>
    %3 = tpu.matmul %0, %2, %cst {dimension_numbers = #tpu.dot_dimension_numbers<[1], [0], [0], [1], [0, 0, 1, 1], [], []>} : vector<32x112xbf16>, vector<112x128xbf16>, vector<32x128xf32> -> vector<32x128xf32>
    %4 = vector.extract_strided_slice %3 {offsets = [0, 0], sizes = [8, 128], strides = [1, 1]} : vector<32x128xf32> to vector<8x128xf32>
    %5 = vector.extract_strided_slice %3 {offsets = [8, 0], sizes = [8, 128], strides = [1, 1]} : vector<32x128xf32> to vector<8x128xf32>
    %6 = arith.maximumf %4, %5 : vector<8x128xf32>
    %7 = vector.extract_strided_slice %3 {offsets = [16, 0], sizes = [8, 128], strides = [1, 1]} : vector<32x128xf32> to vector<8x128xf32>
    %8 = arith.maximumf %6, %7 : vector<8x128xf32>
    %9 = vector.extract_strided_slice %3 {offsets = [24, 0], sizes = [8, 128], strides = [1, 1]} : vector<32x128xf32> to vector<8x128xf32>
    %10 = arith.maximumf %8, %9 : vector<8x128xf32>
    %c0_4 = arith.constant 0 : index
    %c0_5 = arith.constant 0 : index
    %11 = vector.load %arg4[%c0_4, %c0_5] : memref<8x1xf32, #tpu.memory_space<vmem>>, vector<8x1xf32>
    %12 = vector.broadcast %11 : vector<8x1xf32> to vector<8x128xf32>
    %13 = arith.addf %10, %12 : vector<8x128xf32>
    %cst_6 = arith.constant 0.000000e+00 : f32
    %14 = vector.broadcast %cst_6 : f32 to vector<8x128xf32>
    %15 = arith.cmpf ogt, %13, %14 : vector<8x128xf32>
    %cst_7 = arith.constant 0.00999999977 : f32
    %16 = vector.broadcast %cst_7 : f32 to vector<8x128xf32>
    %17 = arith.mulf %16, %13 : vector<8x128xf32>
    %18 = arith.select %15, %13, %17 : vector<8x128xi1>, vector<8x128xf32>
    %c0_8 = arith.constant 0 : index
    %c0_9 = arith.constant 0 : index
    %c0_10 = arith.constant 0 : index
    %19 = vector.load %arg5[%c0_8, %c0_9, %c0_10] : memref<1x8x128xf32, #tpu.memory_space<vmem>>, vector<1x8x128xf32>
    %20 = vector.shape_cast %19 : vector<1x8x128xf32> to vector<8x128xf32>
    %21 = vector.shape_cast %18 : vector<8x128xf32> to vector<1x8x128xf32>
    tpu.vector_store %arg5[%c0_8, %c0_9, %c0_10], %21 {strides = array<i32>} : memref<1x8x128xf32, #tpu.memory_space<vmem>>, vector<1x8x128xf32>,
    return
  }
  func.func @transform_0(%arg0: i32, %arg1: i32) -> (i32, i32, i32) {
    %c0_i32 = arith.constant 0 : i32
    %c0_i32_0 = arith.constant 0 : i32
    return %arg0, %c0_i32, %arg1 : i32, i32, i32
  }
  func.func @transform_1(%arg0: i32, %arg1: i32) -> (i32, i32) {
    %c0_i32 = arith.constant 0 : i32
    %c0_i32_0 = arith.constant 0 : i32
    %c0_i32_1 = arith.constant 0 : i32
    return %c0_i32, %c0_i32_0 : i32, i32
  }
  func.func @transform_2(%arg0: i32, %arg1: i32) -> (i32, i32) {
    %c0_i32 = arith.constant 0 : i32
    %c0_i32_0 = arith.constant 0 : i32
    %c0_i32_1 = arith.constant 0 : i32
    return %c0_i32, %c0_i32_0 : i32, i32
  }
  func.func @transform_3(%arg0: i32, %arg1: i32) -> (i32, i32, i32) {
    %c0_i32 = arith.constant 0 : i32
    %c0_i32_0 = arith.constant 0 : i32
    return %arg0, %c0_i32, %arg1 : i32, i32, i32
  }
}

</mosaic_0001>

<bundles_post_ra>
// kernel: tpu_custom_call.1
= control target key start
LH: loop header
LB: loop body
LE: loop exit
PB: predicated region body
PF: predicated region fallthrough
CT: control target
= control target key end

     0   :  { %8 = vsyncpa [#allocation3], 0  ;;  %s916_s0 = inlined_call_operand.hbm [shape: bf16[2,112,128], index: 0, kind: input, shape index: {}]   ;;  %s917_s1 = inlined_call_operand.hbm [shape: bf16[32,112], index: 1, kind: input, shape index: {}]   ;;  %s918_s2 = inlined_call_operand.vmem [shape: f32[8,1], index: 2, kind: input, shape index: {}]   ;;  %s919_s3 = inlined_call_operand.hbm [shape: f32[2,8,128], index: 3, kind: output, shape index: {}]  }
   0x1   :  { %10 = vsyncpa [#allocation3 + $0x1], 0 }
   0x2   :  { %11 = vsyncpa [#allocation6], 0 }
   0x3   :  { %12 = vsyncpa [#allocation4], 0 }
   0x4   :  { %14 = vsyncpa [#allocation4 + $0x1], 0  ;;  %s763_s12 = smov 0   ;;  %s765_s13 = smov 0  }
   0x5   :  { %s767_s14 = smov 0   ;;  %s769_s15 = smov 0  }
   0x6   :  { %s771_s16 = smov 0   ;;  %s773_s17 = smov 0  }
   0x7 LB: > { %s444_s18 = sadd.s32 4294967295, %s737_s17   ;;  %s445_s19 = sadd.s32 4294967294, %s737_s17   ;;  %s737_s17 = sphi %s773_s17, %s20_s17   ;;  %s733_s16 = sphi %s771_s16, %s930_s16   ;;  %s729_s15 = sphi %s769_s15, %s929_s15   ;;  %s725_s14 = sphi %s767_s14, %s928_s14   ;;  %s721_s13 = sphi %s765_s13, %s927_s13   ;;  %s717_s12 = sphi %s763_s12, %s926_s12  }
   0x8   : > { %p54_p0 = scmp.ne.s32.totalorder %s721_s13, %s717_s12  ;;  %p797_p1 = scmp.eq.s32.totalorder %s444_s18, 0 }
   0x9   : > { %p801_p2 = scmp.eq.s32.totalorder %s444_s18, 1  ;;  %p128_p3 = scmp.eq.s32.totalorder %s445_s19, 1 }
   0xa   : > { %p807_p4 = por %p797_p1, %p54_p0  ;;  %p446_p5 = scmp.ge.s32.totalorder %s737_s17, 1 }
   0xb   : > { %p812_p6 = por %p128_p3, %p54_p0  ;;  %p135_p7 = scmp.lt.s32.totalorder %s737_s17, 3 }
   0xc   : > { %s146_s26 = sshll.u32 %s917_s1, 4  ;;  %s739_s28 = smov [#allocation5]   ;;  %s147_s26 = int_to_ptr.hbm [resolvable:$true] %s146_s26 }
   0xd   : > { %p820_p8 = pnand %p446_p5, %p135_p7  ;;  %s148_s29 = sshll.u32 %s739_s28, 4  ;;  %s149_s29 = int_to_ptr.vmem [resolvable:$true] %s148_s29 }
   0xe   : > { %p448_p11 = scmp.ge.s32.totalorder %s737_s17, 2  ;;  %s740_s30 = smov 64  }
   0xf   : > { %p522_p9 = pneg %p820_p8  ;;  %s741_s4 = smov 4  }
  0x10   : > { %s32_s5 = sadd.s32 1, %s733_s16  ;;  %s41_s6 = sadd.s32 1, %s725_s14 }
  0x11   : > { %p523_p10 = pnand %p522_p9, %p797_p1  ;;  %p34_p12 = scmp.ge.s32.totalorder %s32_s5, 2 }
  0x12   : > { %p48_p13 = scmp.ne.s32.totalorder %s725_s14, %s721_s13  ;;  %p49_p0 = scmp.eq.s32.totalorder %s737_s17, 0 }
  0x13   : > { %525 = dma.hbm_to_vmem [thread:$0]  (!%p523_p10), %s147_s26, 256, %s149_s29, [#allocation6], %s740_s30, %s740_s30, %s741_s4  }
  0x14   : > { %s932_s5 = smov (%p34_p12, %s32_s5), 0  ;;  %p50_p3 = por %p49_p0, %p48_p13 }
  0x15   : > { %p841_p5 = por %p801_p2, %p48_p13  ;;  %s36_s8 = ssub.s32 %s733_s16, %s932_s5 }
  0x16   : > { %p535_p7 = scmp.lt.s32.totalorder %s737_s17, 2  ;;  %p39_p9 = scmp.eq.s32.totalorder %s36_s8, 0 }
  0x17   : > { %s165_s9 = sand.u32 1, %s725_s14   ;;  %s512_s18 = smul.u32 56, %s733_s16 }
  0x18   : > { %s511_s10 = smul.u32 56, %s165_s9  ;;  %p527_p10 = pnand %p535_p7, %p50_p3 }
  0x19   : > { %s850_s11 = scalar_select %p39_p9, %s725_s14, %s41_s6  }
  0x1a   : > { %s169_s19 = scalar_lea.vmem [#allocation2], %s511_s10  ;;  %s175_s28 = scalar_lea.hbm %s916_s0, %s512_s18 }
  0x1b   : > { %s178_s24 = sshll.u32 %s169_s19, 4  ;;  %s176_s21 = sshll.u32 %s175_s28, 4  ;;  %s179_s24 = int_to_ptr.vmem [resolvable:$true] %s178_s24  ;;  %s177_s21 = int_to_ptr.hbm [resolvable:$true] %s176_s21 }
  0x1c   : > { %s166_s29 = scalar_lea.sflag [#allocation3], %s165_s9  ;;  %190 = sbr.rel (%p820_p8) target bundleno = 213 (0xd5), region = 32 }
  0x1d   : > { %529 = dma.hbm_to_vmem [thread:$0]  (!%p527_p10), %s177_s21, 896, %s179_s24, %s166_s29, %s740_s30, %s740_s30, %s741_s4  }
  0x1e   : > { %s862_s6 = sand.u32 (!%p820_p8), 1, %s721_s13  }
  0x1f   : > { %s513_s8 = smul.u32 (!%p820_p8), 56, %s862_s6  ;;  %s193_s10 = scalar_lea.sflag (!%p820_p8), [#allocation3], %s862_s6 }
  0x21   : > { %s196_s18 = scalar_lea.vmem [#allocation2], %s513_s8 }
  0x22   : > { %704 = dma.done.wait (%p807_p4), %s193_s10, 896  }
  0x23   : > { %706 = vsyncadd (%p807_p4), %s193_s10, 4294966400 }
  0x24   : > { %708 = dma.done.wait (%p797_p1), [#allocation6], 256  }
  0x25   : > { %710 = vsyncadd (%p797_p1), [#allocation6], 4294967040  ;;  %v742_v0 = vmov 0   ;;  %v503_v1 = vld [vmem:[%s196_s18 + $0x30] sm:$0xff]  ;;  %v502_v2 = vld [vmem:[%s196_s18 + $0x28] sm:$0xff]  ;;  %vm296_vm0 = vcmask 916480  }
  0x26   : > { %590 = vset.pattern.permute.xlu0 %v742_v0  ;;  %304 = vmatpush.bf16.msra.mxu0 %v503_v1  ;;  %v325_v3 = vld [vmem:[%s918_s2] sm:$0xff]  ;;  %v500_v5 = vld [vmem:[%s196_s18 + $0x18] sm:$0xff]  ;;  %v499_v6 = vld [vmem:[%s196_s18 + $0x10] sm:$0xff]  ;;  %s452_s20 = sshll.u32 %s862_s6, 3  ;;  %s492_s22 = sshll.u32 %s729_s15, 3 }
  0x27   : > { %504 = vmatpush.bf16.msra.mxu1 %v503_v1  ;;  %328 = vperm.xlu0 %590, %v325_v3   ;;  %v501_v4 = vld [vmem:[%s196_s18 + $0x20] sm:$0xff]  ;;  %v498_v7 = vld [vmem:[%s196_s18 + $0x8] sm:$0xff]  ;;  %v495_v9 = vld [vmem:[#allocation5] sm:$0xff]  ;;  %s348_s19 = scalar_lea.hbm %s919_s3, %s492_s22  ;;  %s224_s24 = scalar_lea.vmem [#allocation7], %s452_s20 }
  0x28   : > { %v497_v8 = vld [vmem:[%s196_s18] sm:$0xff]  ;;  %s350_s25 = sshll.u32 %s224_s24, 4  ;;  %s352_s26 = sshll.u32 %s348_s19, 4  ;;  %s351_s25 = int_to_ptr.vmem [resolvable:$true] %s350_s25  ;;  %s353_s26 = int_to_ptr.hbm [resolvable:$true] %s352_s26 }
  0x29   : > { %v496_v10 = vld [vmem:[#allocation5 + $0x8] sm:$0xff]  ;;  %s337_s15 = scalar_lea.sflag [#allocation4], %s862_s6  ;;  %s665_s28 = sshra.s32 %s353_s26, 4  ;;  %s666_s28 = int_to_ptr.hbm [resolvable:$true] %s665_s28 }
  0x2a   : > { %305 = vmatpush.bf16.msra.mxu0 %v502_v2  ;;  %s667_s21 = scalar_lea.hbm %s666_s28, 8  ;;  %s671_s10 = scalar_lea.hbm %s919_s3, 16 }
  0x2b   : > { %505 = vmatpush.bf16.msra.mxu1 %v502_v2  ;;  %p668_p1 = scmp.ne.s32.totalorder %s666_s28, %s667_s21  ;;  %p672_p8 = scmp.lt.s32.totalorder %s666_s28, %s919_s3 }
  0x2c   : > { %p673_p12 = scmp.lt.s32.totalorder %s671_s10, %s667_s21 }
  0x2d   : > { %p669_p2 = pnand %p668_p1, %p841_p5 }
  0x2e   : > { %306 = vmatpush.bf16.msra.mxu0 %v501_v4  ;;  %p674_p13 = por %p673_p12, %p672_p8 }
  0x2f   : > { %506 = vmatpush.bf16.msra.mxu1 %v501_v4  ;;  %p670_p4 = pneg %p669_p2 }
  0x31   : > { %p675_p0 = pnand %p674_p13, %p670_p4 }
  0x32   : > { %307 = vmatpush.bf16.msra.mxu0 %v500_v5 }
  0x33   : > { %507 = vmatpush.bf16.msra.mxu1 %v500_v5 }
  0x36   : > { %308 = vmatpush.bf16.msra.mxu0 %v499_v6 }
  0x37   : > { %508 = vmatpush.bf16.msra.mxu1 %v499_v6 }
  0x3a   : > { %309 = vmatpush.bf16.msra.mxu0 %v498_v7 }
  0x3b   : > { %509 = vmatpush.bf16.msra.mxu1 %v498_v7 }
  0x3e   : > { %310 = vmatpush.bf16.msra.mxu0 %v497_v8 }
  0x3f   : > { %510 = vmatpush.bf16.msra.mxu1 %v497_v8 }
  0x41   : > { %489 = vmatmul.msk.bf16.vlgmr.msra.gmra.mxu0 %vm296_vm0, %v495_v9 }
  0x42   : > { %490 = vmatmul.msk.bf16.vlgmr.msra.gmra.mxu1 %vm296_vm0, %v496_v10 }
  0x99   : > { %v329_v17 = vpop.permute.xlu0 %328 }
  0xbe   : > { %v312_v11 = vpop.f32.mrf.mxu0 }
  0xbf   : > { %v317_v12 = vpop.f32.mrf.mxu1 }
  0xc6   : > { %v314_v13 = vpop.f32.mrf.mxu0 }
  0xc7   : > { %v322_v14 = vmax.f32 %v312_v11, %v314_v13  ;;  %v319_v16 = vpop.f32.mrf.mxu1 }
  0xc9   : > { %v323_v15 = vmax.f32 %v322_v14, %v317_v12 }
  0xcb   : > { %v324_v18 = vmax.f32 %v323_v15, %v319_v16 }
  0xcd   : > { %v331_v19 = vadd.f32 %v329_v17, %v324_v18 }
  0xcf   : > { %vm332_vm1 = vcmp.gt.f32.partialorder %v331_v19, 0.0  ;;  %v333_v20 = vmul.f32 0.01, %v331_v19 }
  0xd1   : > { %v334_v21 = vsel %vm332_vm1, %v331_v19, %v333_v20 }
  0xd2   : > { %335 = vst [vmem:[%s224_s24] sm:$0xff] %v334_v21 }
  0xd3   : > { %678 = shalt.err (!%p675_p0)
}
  0xd4   : > { %520 = dma.vmem_to_hbm [thread:$0]  (%p841_p5), %s351_s25, 128, %s353_s26, %s337_s15  }
  0xd5 PF: > { %s364_s6 = sand.u32 1, %s717_s12   ;;  %p531_p3 = pnand %p448_p11, %p812_p6 }
  0xd6   : > { %s365_s30 = scalar_lea.sflag [#allocation4], %s364_s6 }
  0xd7   : > { %p532_p7 = pneg %p531_p3 }
  0xd9   : > { %712 = dma.done.wait (%p532_p7), %s365_s30, 128  }
  0xda   : > { %714 = vsyncadd (%p532_p7), %s365_s30, 4294967168  ;;  %s20_s17 = sadd.s32 1, %s737_s17   ;;  %s926_s12 = smov %s721_s13 }
  0xdb   : > { %p17_p9 = scmp.ge.s32.totalorder %s20_s17, 4   ;;  %s927_s13 = smov %s725_s14 }
  0xdc   : > { %s928_s14 = smov %s850_s11  ;;  %s929_s15 = smov %s733_s16 }
  0xdd   : > { %s930_s16 = smov %s932_s5  ;;  %19 = sbr.rel (!%p17_p9) target bundleno = 7 (0x7), region = 81 }
  0xe2   :  { %371 = vsyncpa [#allocation3], 1 }
  0xe3   :  { %373 = vsyncpa [#allocation3 + $0x1], 1 }
  0xe4   :  { %374 = vsyncpa [#allocation6], 1 }
  0xe5   :  { %375 = vsyncpa [#allocation4], 1 }
  0xe6   :  { %377 = vsyncpa [#allocation4 + $0x1], 1 }

</bundles_post_ra>
